<compile_context>
chip_gen: v7x
topology: tpu7x:2x2x1
jax: 0.10.0
libtpu: 0.0.40
codegen_flags: <defaults>
</compile_context>

<pallas_src>
import functools

import jax
import jax.numpy as jnp
from jax.experimental import pallas as pl
from jax.experimental.pallas import tpu as pltpu

_LANE = 128      # lane width (last dim alignment)
_SUBLANE = 8     # f32 sublane (second-to-last dim alignment)


def _round_up(x, m):
    return ((x + m - 1) // m) * m


def _cdiv(a, b):
    return -(-a // b)


def _apply_activation(y, activation):
    a = activation.lower()
    if a == "relu":
        return jnp.maximum(y, 0.0)
    if a == "sigmoid":
        return jax.nn.sigmoid(y)
    if a == "tanh":
        return jnp.tanh(y)
    if a == "leakyrelu":
        return jnp.where(y >= 0.0, y, 0.01 * y)
    if a == "none":
        return y
    raise NotImplementedError(f"activation {activation!r}")


def _fused_mlp_kernel(*refs, num_layers: int, activation: str):
    """Fused MLP chunk: refs = (x_ref, w1, b1, ..., wL, bL, o_ref).

    One row-tile of activations flows through all layers entirely in VMEM / vregs.
    Matmul operands are bf16 (MXU-native), accumulation/bias/activation are f32.
    """
    x_ref = refs[0]
    o_ref = refs[-1]
    h = x_ref[...].astype(jnp.float32)
    for l in range(num_layers):
        w_ref = refs[1 + 2 * l]
        b_ref = refs[2 + 2 * l]
        y = jnp.dot(h.astype(w_ref.dtype), w_ref[...],
                    preferred_element_type=jnp.float32)
        y = y + b_ref[...].astype(jnp.float32)     # (1, pd_out) bias broadcasts over rows
        h = _apply_activation(y, activation)
    o_ref[...] = h.astype(o_ref.dtype)


def init_mlp_params(layers, key):
    """Deterministic init matching nn.Linear shapes.

    PyTorch nn.Linear(in, out): weight (out, in), bias (out,). We store the transpose
    (in, out) so the kernel computes x @ W directly.
    """
    params = []
    for h_in, h_out in zip(layers[:-1], layers[1:]):
        k_w, k_b, key = jax.random.split(key, 3)
        bound = 1.0 / (h_in ** 0.5)  # PyTorch default Linear init range
        w = jax.random.uniform(k_w, (h_in, h_out), jnp.float32, -bound, bound)
        b = jax.random.uniform(k_b, (h_out,), jnp.float32, -bound, bound)
        params.append((w, b))
    return params


def prepare_mlp_params(params, activation="relu", matmul_dtype=jnp.bfloat16):
    """One-time padding + dtype cast of weights/biases (hoisted out of the forward).

    Weights are lane-padded to multiples of 128 on both dims and cast to bf16 (MXU
    operand dtype); biases stay f32 and are stored as a (1, pd_out) row.
    """
    dims = [params[0][0].shape[0]] + [w.shape[1] for (w, _) in params]
    pdims = [_round_up(d, _LANE) for d in dims]
    weights, biases = [], []
    for l, (w, b) in enumerate(params):
        wi, wo = w.shape
        wp = jnp.zeros((pdims[l], pdims[l + 1]), matmul_dtype)
        wp = wp.at[:wi, :wo].set(w.astype(matmul_dtype))
        bp = jnp.zeros((1, pdims[l + 1]), jnp.float32).at[0, :wo].set(b.astype(jnp.float32))
        weights.append(wp)
        biases.append(bp)
    return {"dims": dims, "pdims": pdims, "weights": weights, "biases": biases,
            "activation": activation}


def _vmem_budget_bytes():
    try:
        cap = pltpu.get_tpu_info().vmem_capacity_bytes
    except Exception:
        cap = 64 * 1024 * 1024   # conservative (v7x per-TC VMEM)
    return (cap * 3) // 4        # leave headroom for compiler scratch / I/O buffers


def _fused_chunk_call(xp, weights, biases, tile_m, activation, vmem_limit_bytes):
    """Run one fused chunk of layers on an already lane/row-padded input (n_pad, pd_in)."""
    n_pad, pd_in = xp.shape
    pd_out = weights[-1].shape[1]
    num_layers = len(weights)

    flat_args = [xp]
    in_specs = [pl.BlockSpec((tile_m, pd_in), lambda i: (i, 0))]
    for w, b in zip(weights, biases):
        flat_args.extend([w, b])
        # Grid-invariant blocks: fetched once, single pipeline buffer is enough.
        in_specs.append(pl.BlockSpec(w.shape, lambda i: (0, 0),
                                     pipeline_mode=pl.Buffered(1)))
        in_specs.append(pl.BlockSpec(b.shape, lambda i: (0, 0),
                                     pipeline_mode=pl.Buffered(1)))

    kernel = functools.partial(
        _fused_mlp_kernel, num_layers=num_layers, activation=activation)

    return pl.pallas_call(
        kernel,
        out_shape=jax.ShapeDtypeStruct((n_pad, pd_out), xp.dtype),
        grid_spec=pltpu.PrefetchScalarGridSpec(
            num_scalar_prefetch=0,
            grid=(n_pad // tile_m,),
            in_specs=in_specs,
            out_specs=pl.BlockSpec((tile_m, pd_out), lambda i: (i, 0)),
        ),
        compiler_params=pltpu.CompilerParams(
            dimension_semantics=("parallel",),
            vmem_limit_bytes=int(vmem_limit_bytes),
        ),
    )(*flat_args)


def mlp_layers_forward(x, prepared, dropout=0.0, tile_m=None):
    """MLPLayers.forward: (N, *, H_in) -> (N, *, H_out) via fused Pallas kernel(s)."""
    assert dropout == 0.0  # eval / identity dropout only

    dims, pdims = prepared["dims"], prepared["pdims"]
    weights, biases = prepared["weights"], prepared["biases"]
    activation = prepared["activation"]
    num_layers = len(weights)

    lead_shape = x.shape[:-1]
    h_in = x.shape[-1]
    assert h_in == dims[0]
    h_out = dims[-1]

    x2 = x.reshape(-1, h_in)
    n = x2.shape[0]

    # --- generation-aware VMEM budget ---
    budget = _vmem_budget_bytes()
    weight_budget = budget // 2

    # --- split the layer stack into chunks whose single-buffered weights fit VMEM ---
    w_bytes = [w.size * w.dtype.itemsize + b.size * b.dtype.itemsize
               for w, b in zip(weights, biases)]
    for wb in w_bytes:
        assert wb <= weight_budget, (
            "single layer weight exceeds VMEM budget; needs a K/N-tiled contraction grid")
    chunks, cur, cur_bytes = [], [], 0
    for l in range(num_layers):
        if cur and cur_bytes + w_bytes[l] > weight_budget:
            chunks.append(cur)
            cur, cur_bytes = [], 0
        cur.append(l)
        cur_bytes += w_bytes[l]
    chunks.append(cur)
    max_chunk_bytes = max(sum(w_bytes[l] for l in c) for c in chunks)

    # --- row tile: derived from VMEM budget, minimal row-pad waste, >=2 grid steps when
    #     there are >=16 rows so both v7x TensorCores get work on the parallel axis. ---
    itemsize = jnp.dtype(x.dtype).itemsize
    max_pd = max(pdims)
    per_row = 2 * (pdims[0] + pdims[-1]) * itemsize + 3 * max_pd * 4
    avail = max(budget - max_chunk_bytes, per_row * _SUBLANE)
    n8 = _round_up(max(n, 1), _SUBLANE)
    if tile_m is None:
        cap = max(_SUBLANE, min(1024, ((avail // per_row) // _SUBLANE) * _SUBLANE))
        if n8 >= 2 * _SUBLANE:
            cap = min(cap, max(_SUBLANE, ((n8 // 2) // _SUBLANE) * _SUBLANE))
        steps = _cdiv(n8, cap)
        tile = _round_up(_cdiv(n8, steps), _SUBLANE)
    else:
        tile = _round_up(tile_m, _SUBLANE)
        steps = _cdiv(n8, tile)
    n_pad = tile * steps

    # --- input: skip the extra padded materialization when already aligned ---
    pd_in = pdims[0]
    if n_pad == n and h_in == pd_in:
        h = x2
    else:
        h = jnp.zeros((n_pad, pd_in), x2.dtype).at[:n, :h_in].set(x2)

    # --- run fused chunk(s); intermediates stay lane-padded between chunks ---
    for c in chunks:
        h = _fused_chunk_call(h,
                              [weights[l] for l in c],
                              [biases[l] for l in c],
                              tile, activation, budget)

    out = h[:n, :h_out]
    return out.reshape(*lead_shape, h_out)


def _reference(x, params, activation="relu", mirror_bf16=True):
    """Pure-JAX reference. mirror_bf16=True mirrors the kernel's bf16-operand matmuls."""
    lead_shape = x.shape[:-1]
    h = x.reshape(-1, x.shape[-1]).astype(jnp.float32)
    for (w, b) in params:
        if mirror_bf16:
            y = jnp.dot(h.astype(jnp.bfloat16), w.astype(jnp.bfloat16),
                        preferred_element_type=jnp.float32)
        else:
            y = h @ w
        y = y + b
        if activation == "relu":
            h = jnp.maximum(y, 0.0)
        else:
            h = _apply_activation(y, activation)
    return h.reshape(*lead_shape, params[-1][0].shape[1])


if __name__ == "__main__":
    key = jax.random.PRNGKey(0)
    layers = [32, 64, 16]   # MLPLayers([32, 64, 16], dropout=0.0, activation='relu')
    batch = 8

    k_x, k_p, k_x2 = jax.random.split(key, 3)
    params = init_mlp_params(layers, k_p)
    prepared = prepare_mlp_params(params, activation="relu")   # pad + bf16-cast ONCE

    # 2-D input (N, H_in)
    x = jax.random.normal(k_x, (batch, layers[0]), dtype=jnp.float32)
    out = mlp_layers_forward(x, prepared)
    jax.block_until_ready(out)
    assert out.shape == (batch, layers[-1]), out.shape
    ref_bf16 = _reference(x, params, mirror_bf16=True)
    ref_f32 = _reference(x, params, mirror_bf16=False)
    assert jnp.allclose(out, ref_bf16, atol=2e-3, rtol=2e-3), \
        float(jnp.max(jnp.abs(out - ref_bf16)))
    assert jnp.allclose(out, ref_f32, atol=5e-2, rtol=5e-2), \
        float(jnp.max(jnp.abs(out - ref_f32)))

    # (N, *, H_in) input exercises the leading-dim flatten/reshape path
    x3 = jax.random.normal(k_x2, (2, 4, layers[0]), dtype=jnp.float32)
    out3 = mlp_layers_forward(x3, prepared)
    jax.block_until_ready(out3)
    assert out3.shape == (2, 4, layers[-1]), out3.shape
    ref3 = _reference(x3, params, mirror_bf16=True)
    assert jnp.allclose(out3, ref3, atol=2e-3, rtol=2e-3), \
        float(jnp.max(jnp.abs(out3 - ref3)))

    print("KERNEL_OK")
</pallas_src>

<mosaic_0001>
module attributes {stable_mosaic.version = 11 : i64} {
  func.func @_fused_mlp_kernel(%arg0: i32, %arg1: memref<8x128xf32, #tpu.memory_space<vmem>>, %arg2: memref<128x128xbf16, #tpu.memory_space<vmem>>, %arg3: memref<1x128xf32, #tpu.memory_space<vmem>>, %arg4: memref<128x128xbf16, #tpu.memory_space<vmem>>, %arg5: memref<1x128xf32, #tpu.memory_space<vmem>>, %arg6: memref<8x128xf32, #tpu.memory_space<vmem>>) attributes {dimension_semantics = [#tpu.dimension_semantics<parallel>], iteration_bounds = array<i64: 1>, scalar_prefetch = 0 : i64, scratch_operands = 0 : i64, tpu.core_type = #tpu.core_type<tc>, window_params = [{transform_indices = @transform_0, window_bounds = array<i64: 8, 128>}, {pipeline_mode = #tpu.pipeline_mode<synchronous>, transform_indices = @transform_1, window_bounds = array<i64: 128, 128>}, {pipeline_mode = #tpu.pipeline_mode<synchronous>, transform_indices = @transform_2, window_bounds = array<i64: 1, 128>}, {pipeline_mode = #tpu.pipeline_mode<synchronous>, transform_indices = @transform_3, window_bounds = array<i64: 128, 128>}, {pipeline_mode = #tpu.pipeline_mode<synchronous>, transform_indices = @transform_4, window_bounds = array<i64: 1, 128>}, {transform_indices = @transform_5, window_bounds = array<i64: 8, 128>}]} {
    %c0 = arith.constant 0 : index
    %c0_0 = arith.constant 0 : index
    %0 = vector.load %arg1[%c0, %c0_0] : memref<8x128xf32, #tpu.memory_space<vmem>>, vector<8x128xf32>
    %1 = arith.truncf %0 : vector<8x128xf32> to vector<8x128xbf16>
    %c0_1 = arith.constant 0 : index
    %c0_2 = arith.constant 0 : index
    %2 = vector.load %arg2[%c0_1, %c0_2] : memref<128x128xbf16, #tpu.memory_space<vmem>>, vector<128x128xbf16>
    %cst = arith.constant dense<0.000000e+00> : vector<8x128xf32>
    %3 = tpu.matmul %1, %2, %cst {dimension_numbers = #tpu.dot_dimension_numbers<[1], [0], [0], [1], [0, 0, 1, 1], [], []>} : vector<8x128xbf16>, vector<128x128xbf16>, vector<8x128xf32> -> vector<8x128xf32>
    %c0_3 = arith.constant 0 : index
    %c0_4 = arith.constant 0 : index
    %4 = vector.load %arg3[%c0_3, %c0_4] : memref<1x128xf32, #tpu.memory_space<vmem>>, vector<1x128xf32>
    %5 = vector.broadcast %4 : vector<1x128xf32> to vector<8x128xf32>
    %6 = arith.addf %3, %5 : vector<8x128xf32>
    %cst_5 = arith.constant 0.000000e+00 : f32
    %7 = vector.broadcast %cst_5 : f32 to vector<8x128xf32>
    %8 = arith.maximumf %6, %7 : vector<8x128xf32>
    %9 = arith.truncf %8 : vector<8x128xf32> to vector<8x128xbf16>
    %c0_6 = arith.constant 0 : index
    %c0_7 = arith.constant 0 : index
    %10 = vector.load %arg4[%c0_6, %c0_7] : memref<128x128xbf16, #tpu.memory_space<vmem>>, vector<128x128xbf16>
    %cst_8 = arith.constant dense<0.000000e+00> : vector<8x128xf32>
    %11 = tpu.matmul %9, %10, %cst_8 {dimension_numbers = #tpu.dot_dimension_numbers<[1], [0], [0], [1], [0, 0, 1, 1], [], []>} : vector<8x128xbf16>, vector<128x128xbf16>, vector<8x128xf32> -> vector<8x128xf32>
    %c0_9 = arith.constant 0 : index
    %c0_10 = arith.constant 0 : index
    %12 = vector.load %arg5[%c0_9, %c0_10] : memref<1x128xf32, #tpu.memory_space<vmem>>, vector<1x128xf32>
    %13 = vector.broadcast %12 : vector<1x128xf32> to vector<8x128xf32>
    %14 = arith.addf %11, %13 : vector<8x128xf32>
    %cst_11 = arith.constant 0.000000e+00 : f32
    %15 = vector.broadcast %cst_11 : f32 to vector<8x128xf32>
    %16 = arith.maximumf %14, %15 : vector<8x128xf32>
    %c0_12 = arith.constant 0 : index
    %c0_13 = arith.constant 0 : index
    %17 = vector.load %arg6[%c0_12, %c0_13] : memref<8x128xf32, #tpu.memory_space<vmem>>, vector<8x128xf32>
    tpu.vector_store %arg6[%c0_12, %c0_13], %16 {strides = array<i32>} : memref<8x128xf32, #tpu.memory_space<vmem>>, vector<8x128xf32>,
    return
  }
  func.func @transform_0(%arg0: i32) -> (i32, i32) {
    %c0_i32 = arith.constant 0 : i32
    %c0_i32_0 = arith.constant 0 : i32
    return %arg0, %c0_i32 : i32, i32
  }
  func.func @transform_1(%arg0: i32) -> (i32, i32) {
    %c0_i32 = arith.constant 0 : i32
    %c0_i32_0 = arith.constant 0 : i32
    %c0_i32_1 = arith.constant 0 : i32
    return %c0_i32, %c0_i32_0 : i32, i32
  }
  func.func @transform_2(%arg0: i32) -> (i32, i32) {
    %c0_i32 = arith.constant 0 : i32
    %c0_i32_0 = arith.constant 0 : i32
    %c0_i32_1 = arith.constant 0 : i32
    return %c0_i32, %c0_i32_0 : i32, i32
  }
  func.func @transform_3(%arg0: i32) -> (i32, i32) {
    %c0_i32 = arith.constant 0 : i32
    %c0_i32_0 = arith.constant 0 : i32
    %c0_i32_1 = arith.constant 0 : i32
    return %c0_i32, %c0_i32_0 : i32, i32
  }
  func.func @transform_4(%arg0: i32) -> (i32, i32) {
    %c0_i32 = arith.constant 0 : i32
    %c0_i32_0 = arith.constant 0 : i32
    %c0_i32_1 = arith.constant 0 : i32
    return %c0_i32, %c0_i32_0 : i32, i32
  }
  func.func @transform_5(%arg0: i32) -> (i32, i32) {
    %c0_i32 = arith.constant 0 : i32
    %c0_i32_0 = arith.constant 0 : i32
    return %arg0, %c0_i32 : i32, i32
  }
}

</mosaic_0001>

<bundles_post_ra>
// kernel: tpu_custom_call.1
= control target key start
LH: loop header
LB: loop body
LE: loop exit
PB: predicated region body
PF: predicated region fallthrough
CT: control target
= control target key end

     0   :  { %10 = vsyncpa [#allocation3], 0  ;;  %s597_s0 = inlined_call_operand.hbm [shape: f32[8,128], index: 0, kind: input, shape index: {}]   ;;  %s598_s1 = inlined_call_operand.hbm [shape: bf16[128,128], index: 1, kind: input, shape index: {}]   ;;  %s599_s2 = inlined_call_operand.vmem [shape: f32[1,128], index: 2, kind: input, shape index: {}]   ;;  %s600_s3 = inlined_call_operand.hbm [shape: bf16[128,128], index: 3, kind: input, shape index: {}]   ;;  %s601_s4 = inlined_call_operand.vmem [shape: f32[1,128], index: 4, kind: input, shape index: {}]   ;;  %s602_s5 = inlined_call_operand.hbm [shape: f32[8,128], index: 5, kind: output, shape index: {}]  }
   0x1   :  { %11 = vsyncpa [#allocation6], 0 }
   0x2   :  { %12 = vsyncpa [#allocation4], 0  ;;  %s499_s18 = smov [#allocation5]   ;;  %s405_s22 = scalar_lea.hbm %s598_s1, 1024 }
   0x3   :  { %s28_s19 = sshll.u32 %s499_s18, 4  ;;  %p406_p0 = scmp.ne.s32.totalorder %s598_s1, %s405_s22  ;;  %s29_s19 = int_to_ptr.vmem [resolvable:$true] %s28_s19 }
   0x4   :  { %p409_p1 = scmp.lt.u32.totalorder %s405_s22, %s598_s1 }
   0x6   :  { %p411_p2 = pnand %p409_p1, %p406_p0 }
   0x8   :  { %414 = shalt.err (!%p411_p2)
}
   0x9   :  { %s415_s27 = scalar_lea.vmem %s29_s19, 1024  ;;  %p420_p4 = scmp.lt.s32.totalorder %s29_s19, %s29_s19 }
   0xa   :  { %p416_p3 = scmp.ne.s32.totalorder %s29_s19, %s415_s27  ;;  %p421_p5 = scmp.lt.s32.totalorder %s415_s27, %s415_s27 }
   0xc   :  { %p422_p6 = por %p421_p5, %p420_p4 }
   0xe   :  { %p423_p7 = pnand %p422_p6, %p416_p3 }
  0x10   :  { %426 = shalt.err (!%p423_p7)
}
  0x11   :  { %s500_s28 = smov 64   ;;  %s501_s29 = smov 4  }
  0x12   :  { %34 = dma.hbm_to_vmem [thread:$0]  %s598_s1, 1024, %s29_s19, [#allocation6], %s500_s28, %s500_s28, %s501_s29  }
  0x13   :  { %s502_s7 = smov [#allocation2]   ;;  %s503_s9 = smov [#allocation7]  }
  0x14   :  { %s19_s8 = sshll.u32 %s502_s7, 4  ;;  %s42_s10 = sshll.u32 %s503_s9, 4  ;;  %s20_s8 = int_to_ptr.vmem [resolvable:$true] %s19_s8  ;;  %s43_s10 = int_to_ptr.vmem [resolvable:$true] %s42_s10 }
  0x15   :  { %s427_s13 = scalar_lea.hbm %s597_s0, 128 }
  0x16   :  { %p428_p8 = scmp.ne.s32.totalorder %s597_s0, %s427_s13  ;;  %p431_p9 = scmp.lt.u32.totalorder %s427_s13, %s597_s0 }
  0x18   :  { %p433_p10 = pnand %p431_p9, %p428_p8 }
  0x1a   :  { %436 = shalt.err (!%p433_p10)
}
  0x1b   :  { %s437_s1 = scalar_lea.vmem %s20_s8, 128  ;;  %p442_p12 = scmp.lt.s32.totalorder %s20_s8, %s20_s8 }
  0x1c   :  { %p438_p11 = scmp.ne.s32.totalorder %s20_s8, %s437_s1  ;;  %p443_p13 = scmp.lt.s32.totalorder %s437_s1, %s437_s1 }
  0x1e   :  { %p444_p0 = por %p443_p13, %p442_p12 }
  0x20   :  { %p445_p1 = pnand %p444_p0, %p438_p11 }
  0x22   :  { %448 = shalt.err (!%p445_p1)
}
  0x23   :  { %22 = dma.hbm_to_vmem [thread:$0]  %s597_s0, 128, %s20_s8, [#allocation3]  }
  0x24   :  { %s449_s22 = scalar_lea.hbm %s600_s3, 1024 }
  0x25   :  { %p450_p2 = scmp.ne.s32.totalorder %s600_s3, %s449_s22  ;;  %p453_p3 = scmp.lt.u32.totalorder %s449_s22, %s600_s3 }
  0x27   :  { %p455_p4 = pnand %p453_p3, %p450_p2 }
  0x29   :  { %458 = shalt.err (!%p455_p4)
}
  0x2a   :  { %s459_s27 = scalar_lea.vmem %s43_s10, 1024  ;;  %p464_p6 = scmp.lt.s32.totalorder %s43_s10, %s43_s10 }
  0x2b   :  { %p460_p5 = scmp.ne.s32.totalorder %s43_s10, %s459_s27  ;;  %p465_p7 = scmp.lt.s32.totalorder %s459_s27, %s459_s27 }
  0x2d   :  { %p466_p8 = por %p465_p7, %p464_p6 }
  0x2f   :  { %p467_p9 = pnand %p466_p8, %p460_p5 }
  0x31   :  { %470 = shalt.err (!%p467_p9)
}
  0x32   :  { %48 = dma.hbm_to_vmem [thread:$0]  %s600_s3, 1024, %s43_s10, [#allocation6], %s500_s28, %s500_s28, %s501_s29  }
  0x33   :  { %493 = dma.done.wait [#allocation3], 128  }
  0x34   :  { %494 = vsyncadd [#allocation3], 4294967168 }
  0x35   :  { %495 = dma.done.wait [#allocation6], 2048  }
  0x36   :  { %496 = vsyncadd [#allocation6], 4294965248  ;;  %v504_v0 = vmov 0.0   ;;  %vm505_vm0 = vmmov 0   ;;  %v389_v1 = vld [vmem:[#allocation5] sm:$0xff]   ;;  %v390_v2 = vld [vmem:[#allocation5 + $0x8] sm:$0xff]  }
  0x37   :  { %341 = vmatprep.subr.bf16.mxu0 %v504_v0  ;;  %357 = vmatprep.mubr.msk.bf16.mxu0 %vm505_vm0, %v504_v0  ;;  %v391_v3 = vld [vmem:[#allocation5 + $0x10] sm:$0xff]   ;;  %v397_v4 = vld [vmem:[#allocation7] sm:$0xff]   ;;  %v392_v5 = vld [vmem:[#allocation5 + $0x18] sm:$0xff]   ;;  %s506_s7 = smov [#allocation8]  }
  0x38   :  { %361 = vmatprep.subr.bf16.mxu1 %v504_v0  ;;  %377 = vmatprep.mubr.msk.bf16.mxu1 %vm505_vm0, %v504_v0  ;;  %v398_v6 = vld [vmem:[#allocation7 + $0x8] sm:$0xff]   ;;  %v393_v7 = vld [vmem:[#allocation5 + $0x20] sm:$0xff]   ;;  %v399_v8 = vld [vmem:[#allocation7 + $0x10] sm:$0xff]   ;;  %s295_s8 = sshll.u32 %s506_s7, 4  ;;  %s296_s8 = int_to_ptr.vmem [resolvable:$true] %s295_s8 }
  0x39   :  { %342 = vmatpush3.bf16.msra.mxu0 %v389_v1  ;;  %362 = vmatpush3.bf16.msra.mxu1 %v397_v4  ;;  %v394_v9 = vld [vmem:[#allocation5 + $0x28] sm:$0xff]   ;;  %v400_v10 = vld [vmem:[#allocation7 + $0x18] sm:$0xff]   ;;  %v395_v11 = vld [vmem:[#allocation5 + $0x30] sm:$0xff]   ;;  %p476_p11 = scmp.lt.s32.totalorder %s296_s8, %s296_s8 }
  0x3a   :  { %343 = vmatprep.subr.bf16.mxu0 %v504_v0  ;;  %363 = vmatprep.subr.bf16.mxu1 %v504_v0  ;;  %v401_v12 = vld [vmem:[#allocation7 + $0x20] sm:$0xff]   ;;  %v396_v13 = vld [vmem:[#allocation5 + $0x38] sm:$0xff]   ;;  %v402_v15 = vld [vmem:[#allocation7 + $0x28] sm:$0xff]  }
  0x3b   :  { %v61_v14 = vld [vmem:[#allocation2] sm:$0xff]  ;;  %v403_v17 = vld [vmem:[#allocation7 + $0x30] sm:$0xff]  }
  0x3c   :  { %v62_v16 = vpack.c.bf16 %v61_v14, %v61_v14  ;;  %v404_v18 = vld [vmem:[#allocation7 + $0x38] sm:$0xff]  }
  0x3d   :  { %344 = vmatpush3.bf16.msra.mxu0 %v390_v2  ;;  %364 = vmatpush3.bf16.msra.mxu1 %v398_v6  ;;  %v305_v19 = vld [vmem:[%s599_s2] ss:$0 sm:$0xff]  ;;  %s471_s2 = scalar_lea.vmem %s296_s8, 128 }
  0x3e   :  { %345 = vmatprep.subr.bf16.mxu0 %v504_v0  ;;  %365 = vmatprep.subr.bf16.mxu1 %v504_v0  ;;  %v314_v27 = vld [vmem:[%s601_s4] ss:$0 sm:$0xff]  ;;  %p472_p10 = scmp.ne.s32.totalorder %s296_s8, %s471_s2  ;;  %p477_p12 = scmp.lt.s32.totalorder %s471_s2, %s471_s2 }
  0x40   :  { %p478_p13 = por %p477_p12, %p476_p11 }
  0x41   :  { %346 = vmatpush3.bf16.msra.mxu0 %v391_v3  ;;  %366 = vmatpush3.bf16.msra.mxu1 %v399_v8 }
  0x42   :  { %347 = vmatprep.subr.bf16.mxu0 %v504_v0  ;;  %367 = vmatprep.subr.bf16.mxu1 %v504_v0  ;;  %p479_p0 = pnand %p478_p13, %p472_p10 }
  0x45   :  { %348 = vmatpush3.bf16.msra.mxu0 %v392_v5  ;;  %368 = vmatpush3.bf16.msra.mxu1 %v400_v10 }
  0x46   :  { %349 = vmatprep.subr.bf16.mxu0 %v504_v0  ;;  %369 = vmatprep.subr.bf16.mxu1 %v504_v0 }
  0x49   :  { %350 = vmatpush3.bf16.msra.mxu0 %v393_v7  ;;  %370 = vmatpush3.bf16.msra.mxu1 %v401_v12 }
  0x4a   :  { %351 = vmatprep.subr.bf16.mxu0 %v504_v0  ;;  %371 = vmatprep.subr.bf16.mxu1 %v504_v0 }
  0x4d   :  { %352 = vmatpush3.bf16.msra.mxu0 %v394_v9  ;;  %372 = vmatpush3.bf16.msra.mxu1 %v402_v15 }
  0x4e   :  { %353 = vmatprep.subr.bf16.mxu0 %v504_v0  ;;  %373 = vmatprep.subr.bf16.mxu1 %v504_v0 }
  0x51   :  { %354 = vmatpush3.bf16.msra.mxu0 %v395_v11  ;;  %374 = vmatpush3.bf16.msra.mxu1 %v403_v17 }
  0x52   :  { %355 = vmatprep.subr.bf16.mxu0 %v504_v0  ;;  %375 = vmatprep.subr.bf16.mxu1 %v504_v0 }
  0x55   :  { %356 = vmatpush3.bf16.msra.mxu0 %v396_v13  ;;  %376 = vmatpush3.bf16.msra.mxu1 %v404_v18 }
  0x58   :  { %358 = vmatmul.mubr.bf16.vlgmr.msra.gmra.mrb[0].mxu0 %v62_v16 }
 0x12b   :  { %v168_v20 = vpop.f32.mrb[0].mxu0 }
 0x12c   :  { %v169_v21 = vadd.f32 %v305_v19, %v168_v20  ;;  %v359_v22 = vpop.f32.mrb[1].mxu0 }
 0x12d   :  { %v171_v23 = vpop.f32.mrb[2].mxu0 }
 0x12e   :  { %v174_v24 = vmax.f32 %v169_v21, 0.0  ;;  %v360_v25 = vpop.f32.mrb[3].mxu0 }
 0x130   :  { %v175_v26 = vpack.c.bf16 %v174_v24, %v174_v24 }
 0x132   :  { %378 = vmatmul.mubr.bf16.vlgmr.msra.gmra.mrb[0].mxu1 %v175_v26 }
 0x205   :  { %v281_v28 = vpop.f32.mrb[0].mxu1 }
 0x206   :  { %v282_v29 = vadd.f32 %v314_v27, %v281_v28  ;;  %v379_v30 = vpop.f32.mrb[1].mxu1 }
 0x207   :  { %v284_v31 = vpop.f32.mrb[2].mxu1 }
 0x208   :  { %v287_v32 = vmax.f32 %v282_v29, 0.0  ;;  %v380_v33 = vpop.f32.mrb[3].mxu1 }
 0x20a   :  { %288 = vst [vmem:[#allocation8] sm:$0xff] %v287_v32 }
 0x20b   :  { %482 = shalt.err (!%p479_p0)
}
 0x20c   :  { %s483_s4 = scalar_lea.hbm %s602_s5, 128 }
 0x20d   :  { %p484_p1 = scmp.ne.s32.totalorder %s602_s5, %s483_s4  ;;  %p487_p2 = scmp.lt.u32.totalorder %s483_s4, %s602_s5 }
 0x20f   :  { %p489_p3 = pnand %p487_p2, %p484_p1 }
 0x211   :  { %492 = shalt.err (!%p489_p3)
}
 0x212   :  { %298 = dma.vmem_to_hbm [thread:$0]  %s296_s8, 128, %s602_s5, [#allocation4]  }
 0x213   :  { %497 = dma.done.wait [#allocation4], 128  }
 0x214   :  { %498 = vsyncadd [#allocation4], 4294967168 }
 0x215   :  { %302 = vsyncpa [#allocation3], 1 }
 0x216   :  { %303 = vsyncpa [#allocation6], 1 }
 0x217   :  { %304 = vsyncpa [#allocation4], 1 }

</bundles_post_ra>
